<compile_context>
chip_gen: v5e
topology: v5e:2x2
jax: 0.10.0
libtpu: 0.0.40
codegen_flags: <defaults>
</compile_context>

<pallas_src>
import numpy as np
import jax
import jax.numpy as jnp
from jax.experimental import pallas as pl
from jax.experimental.pallas import tpu as pltpu


def _build_pe_table(d_model: int, max_len: int) -> jnp.ndarray:
    """Deterministic positional-encoding buffer, identical to the PyTorch __init__."""
    assert d_model % 2 == 0, "interleaved sin/cos construction requires even d_model"
    position = jnp.arange(max_len, dtype=jnp.float32)[:, None]                       # (max_len, 1)
    div_term = jnp.exp(
        jnp.arange(0, d_model, 2, dtype=jnp.float32) * (-np.log(10000.0) / d_model)
    )                                                                                 # (d_model/2,)
    ang = position * div_term                                                         # (max_len, d_model/2)
    # interleave: even columns = sin, odd columns = cos
    pe = jnp.stack([jnp.sin(ang), jnp.cos(ang)], axis=-1).reshape(max_len, d_model)
    return pe[:, None, :]                                                             # (max_len, 1, d_model)


def _make_pe_add_kernel(batch_tile: int, d_model: int):
    def kernel(x_ref, pe_ref, o_ref):
        # x_ref / o_ref: (tile_s, batch_tile*D) lane-dense tile
        # pe_ref:        (tile_s, D), already in x.dtype (no in-kernel astype)
        pe = pe_ref[...]
        # Static per-batch slices: views are free, lane-aligned when D % 128 == 0,
        # and avoid materializing a (tile_s, B*D) tiled-pe temporary.
        for b in range(batch_tile):
            sl = slice(b * d_model, (b + 1) * d_model)
            o_ref[:, sl] = x_ref[:, sl] + pe
    return kernel


def _vmem_capacity_bytes() -> int:
    """Physical VMEM of the current chip; conservative fallback if unavailable."""
    try:
        info = pltpu.get_tpu_info()
        cap = int(getattr(info, "vmem_capacity_bytes", 0))
        if cap > 0:
            return cap
    except Exception:
        pass
    return 64 << 20  # v7x has 64 MiB/TC; v5e/v6e have 128 MiB — be conservative.


def _sublane_granularity(dtype) -> int:
    """Native sublane packing: 8 rows for 4-byte, 16 for 2-byte, 32 for 1-byte dtypes."""
    itemsize = jnp.dtype(dtype).itemsize
    return 8 * max(1, 4 // itemsize)


def _choose_tiles(S: int, B: int, D: int, itemsize: int, gran: int,
                  target_block_bytes: int):
    """Pick (tile_s, tile_b): seq rows per block and batch elements per block."""
    per_batch_row = D * itemsize
    tile_b = B
    # Split the lane axis over batch only when one gran-row full-width block would
    # blow the budget AND lane tiles stay 128-aligned (D % 128 == 0).
    if B > 1 and D % 128 == 0:
        while tile_b > 1 and gran * tile_b * per_batch_row > target_block_bytes:
            tile_b -= 1
        while tile_b > 1 and B % tile_b:
            tile_b -= 1
    # TODO(synk): if a single gran-row (1, D) slab still exceeds the budget
    # (enormous d_model), a third split over D would be needed; not implemented.
    row_bytes = max(tile_b * per_batch_row, 1)

    tile_s = (target_block_bytes // row_bytes) // gran * gran
    tile_s = max(gran, tile_s)
    if tile_s >= S:
        if S > gran:
            # Budget would give a single step: split into >=2 balanced-ish steps
            # along the "parallel" seq axis so both v7x TensorCores stream.
            half = -(-S // 2)
            tile_s = -(-half // gran) * gran
            if tile_s >= S:
                tile_s = gran
        else:
            tile_s = S  # tiny S: block equals the full array dim (always legal)
    return tile_s, tile_b


def positional_encoding_forward(
    x: jnp.ndarray,
    pe: jnp.ndarray,
    *,
    target_block_bytes: int | None = None,
    donate_x: bool = False,
):
    """x: (S, B, D); pe: (max_len, 1, D).  Returns x + pe[:S] (broadcast over B).

    NOTE: this op is pure HBM tax (read+write of x for one VPU add). If it sits
    next to the embedding scale or first projection, fuse the add there instead.
    """
    S, B, D = x.shape
    itemsize = jnp.dtype(x.dtype).itemsize
    gran = _sublane_granularity(x.dtype)

    cap = _vmem_capacity_bytes()
    if target_block_bytes is None:
        # ~6 MiB x-blocks on 64 MiB-VMEM chips (v7x), ~12 MiB on 128 MiB (v5e/v6e).
        target_block_bytes = int(min(16 << 20, max(2 << 20, cap // 10)))

    tile_s, tile_b = _choose_tiles(S, B, D, itemsize, gran, target_block_bytes)

    # pe sliced exactly like `self.pe[:x.size(0), :]`, pre-cast to x.dtype
    # (cache this at model init in real use — zero per-call cost).
    pe2d = pe.reshape(pe.shape[0], D)[:S].astype(x.dtype)
    x2d = x.reshape(S, B * D)  # free, contiguous reshape → lane-dense layout

    # Double-buffered footprint: 2 * (x block + out block + pe block).
    x_block = tile_s * tile_b * D * itemsize
    pe_block = tile_s * D * itemsize
    footprint = 2 * (2 * x_block + pe_block)
    vmem_limit = int(min(max(32 << 20, footprint + (4 << 20)),
                         max(32 << 20, cap - (16 << 20))))

    grid = (pl.cdiv(S, tile_s), B // tile_b)

    out2d = pl.pallas_call(
        _make_pe_add_kernel(tile_b, D),
        out_shape=jax.ShapeDtypeStruct((S, B * D), x.dtype),
        grid_spec=pltpu.PrefetchScalarGridSpec(
            num_scalar_prefetch=0,
            grid=grid,
            in_specs=[
                pl.BlockSpec((tile_s, tile_b * D), lambda i, j: (i, j)),
                pl.BlockSpec((tile_s, D), lambda i, j: (i, 0)),
            ],
            out_specs=pl.BlockSpec((tile_s, tile_b * D), lambda i, j: (i, j)),
        ),
        compiler_params=pltpu.CompilerParams(
            # Both axes are independent → "parallel". If a v7x profile shows a
            # single TC streaming, switch the seq axis to pltpu.CORE_PARALLEL.
            dimension_semantics=("parallel", "parallel"),
            vmem_limit_bytes=vmem_limit,
        ),
        # Optional: alias x to the output when the caller no longer needs x
        # (halves peak HBM footprint; bandwidth unchanged).
        input_output_aliases=({0: 0} if donate_x else {}),
    )(x2d, pe2d)

    return out2d.reshape(S, B, D)


if __name__ == "__main__":
    key = jax.random.PRNGKey(0)
    k1, k2 = jax.random.split(key)

    # Config 1: d_model from the spec (128); seq chosen so the parallel grid has
    # 2 steps with a ragged last block (20 = 16 + 4) — exercises masked writeback.
    seq_len, batch, d_model, max_len = 20, 2, 128, 64
    x1 = jax.random.normal(k1, (seq_len, batch, d_model), dtype=jnp.float32)
    pe1 = _build_pe_table(d_model, max_len)
    out1 = jax.block_until_ready(positional_encoding_forward(x1, pe1))
    ref1 = x1 + pe1[:seq_len]
    np.testing.assert_allclose(np.asarray(out1), np.asarray(ref1), rtol=1e-6, atol=1e-6)

    # Config 2: tiny seq / odd batch / small d_model — single full-array block path
    # (lane width < 128, masked stores; correct, just not the fast real-model shape).
    seq_len2, batch2, d_model2, max_len2 = 8, 3, 32, 16
    x2 = jax.random.normal(k2, (seq_len2, batch2, d_model2), dtype=jnp.float32)
    pe2 = _build_pe_table(d_model2, max_len2)
    out2 = jax.block_until_ready(positional_encoding_forward(x2, pe2))
    ref2 = x2 + pe2[:seq_len2]
    np.testing.assert_allclose(np.asarray(out2), np.asarray(ref2), rtol=1e-6, atol=1e-6)

    print("KERNEL_OK")
</pallas_src>

<mosaic_0001>
module attributes {stable_mosaic.version = 11 : i64} {
  func.func @kernel(%arg0: i32, %arg1: i32, %arg2: memref<16x256xf32, #tpu.memory_space<vmem>>, %arg3: memref<16x128xf32, #tpu.memory_space<vmem>>, %arg4: memref<16x256xf32, #tpu.memory_space<vmem>>) attributes {dimension_semantics = [#tpu.dimension_semantics<parallel>, #tpu.dimension_semantics<parallel>], iteration_bounds = array<i64: 2, 1>, scalar_prefetch = 0 : i64, scratch_operands = 0 : i64, tpu.core_type = #tpu.core_type<tc>, window_params = [{transform_indices = @transform_0, window_bounds = array<i64: 16, 256>}, {transform_indices = @transform_1, window_bounds = array<i64: 16, 128>}, {transform_indices = @transform_2, window_bounds = array<i64: 16, 256>}]} {
    %c0 = arith.constant 0 : index
    %c0_0 = arith.constant 0 : index
    %0 = vector.load %arg3[%c0, %c0_0] : memref<16x128xf32, #tpu.memory_space<vmem>>, vector<16x128xf32>
    %c0_1 = arith.constant 0 : index
    %c0_2 = arith.constant 0 : index
    %1 = vector.load %arg2[%c0_1, %c0_2] : memref<16x256xf32, #tpu.memory_space<vmem>>, vector<16x128xf32>
    %2 = arith.addf %1, %0 : vector<16x128xf32>
    %c0_3 = arith.constant 0 : index
    %c0_4 = arith.constant 0 : index
    %3 = vector.load %arg4[%c0_3, %c0_4] : memref<16x256xf32, #tpu.memory_space<vmem>>, vector<16x128xf32>
    tpu.vector_store %arg4[%c0_3, %c0_4], %2 {strides = array<i32>} : memref<16x256xf32, #tpu.memory_space<vmem>>, vector<16x128xf32>,
    %c0_5 = arith.constant 0 : index
    %c128 = arith.constant 128 : index
    %4 = vector.load %arg2[%c0_5, %c128] : memref<16x256xf32, #tpu.memory_space<vmem>>, vector<16x128xf32>
    %5 = arith.addf %4, %0 : vector<16x128xf32>
    %c0_6 = arith.constant 0 : index
    %c128_7 = arith.constant 128 : index
    %6 = vector.load %arg4[%c0_6, %c128_7] : memref<16x256xf32, #tpu.memory_space<vmem>>, vector<16x128xf32>
    tpu.vector_store %arg4[%c0_6, %c128_7], %5 {strides = array<i32>} : memref<16x256xf32, #tpu.memory_space<vmem>>, vector<16x128xf32>,
    return
  }
  func.func @transform_0(%arg0: i32, %arg1: i32) -> (i32, i32) {
    %c0_i32 = arith.constant 0 : i32
    return %arg0, %arg1 : i32, i32
  }
  func.func @transform_1(%arg0: i32, %arg1: i32) -> (i32, i32) {
    %c0_i32 = arith.constant 0 : i32
    %c0_i32_0 = arith.constant 0 : i32
    return %arg0, %c0_i32 : i32, i32
  }
  func.func @transform_2(%arg0: i32, %arg1: i32) -> (i32, i32) {
    %c0_i32 = arith.constant 0 : i32
    return %arg0, %arg1 : i32, i32
  }
}

</mosaic_0001>

<bundles_post_ra>
// kernel: tpu_custom_call.1
= control target key start
LH: loop header
LB: loop body
LE: loop exit
PB: predicated region body
PF: predicated region fallthrough
CT: control target
= control target key end

     0   :  { %7 = vsyncpa [#allocation3], 0  ;;  %s952_s0 = inlined_call_operand.hbm [shape: f32[20,256], index: 0, kind: input, shape index: {}]   ;;  %s953_s1 = inlined_call_operand.hbm [shape: f32[20,128], index: 1, kind: input, shape index: {}]   ;;  %s954_s2 = inlined_call_operand.hbm [shape: f32[20,256], index: 2, kind: output, shape index: {}]  }
   0x1   :  { %9 = vsyncpa [#allocation3 + $0x1], 0 }
   0x2   :  { %10 = vsyncpa [#allocation6], 0 }
   0x3   :  { %12 = vsyncpa [#allocation6 + $0x1], 0 }
   0x4   :  { %13 = vsyncpa [#allocation4], 0 }
   0x5   :  { %15 = vsyncpa [#allocation4 + $0x1], 0  ;;  %s715_s9 = smov 0   ;;  %s717_s10 = smov 0  }
   0x6   :  { %s719_s11 = smov 0   ;;  %s721_s12 = smov 0  }
   0x7   :  { %s723_s13 = smov 0   ;;  %s725_s14 = smov 0  }
   0x8 LB: > { %s410_s15 = sadd.s32 4294967295, %s689_s14   ;;  %s411_s16 = sadd.s32 4294967294, %s689_s14   ;;  %s689_s14 = sphi %s725_s14, %s21_s14   ;;  %s685_s13 = sphi %s723_s13, %s966_s13   ;;  %s681_s12 = sphi %s721_s12, %s965_s12   ;;  %s677_s11 = sphi %s719_s11, %s964_s11   ;;  %s673_s10 = sphi %s717_s10, %s963_s10   ;;  %s669_s9 = sphi %s715_s9, %s962_s9  }
   0x9   : > { %s33_s17 = sadd.s32 1, %s685_s13  ;;  %s42_s18 = sadd.s32 1, %s677_s11 }
   0xa   : > { %p35_p0 = scmp.ge.s32.totalorder %s33_s17, 2  ;;  %p49_p1 = scmp.ne.s32.totalorder %s677_s11, %s673_s10 }
   0xb   : > { %p50_p2 = scmp.eq.s32.totalorder %s689_s14, 0  ;;  %p55_p3 = scmp.ne.s32.totalorder %s673_s10, %s669_s9 }
   0xc   : > { %s968_s17 = smov (%p35_p0, %s33_s17), 0  ;;  %p56_p5 = scmp.eq.s32.totalorder %s410_s15, 0 }
   0xd   : > { %p756_p4 = por %p50_p2, %p49_p1  ;;  %s37_s20 = ssub.s32 %s685_s13, %s968_s17 }
   0xe   : > { %p107_p6 = scmp.eq.s32.totalorder %s410_s15, 1  ;;  %p40_p7 = scmp.eq.s32.totalorder %s37_s20, 0 }
   0xf   : > { %p762_p8 = por %p56_p5, %p55_p3  ;;  %p113_p10 = scmp.eq.s32.totalorder %s411_s16, 1 }
  0x10   : > { %p766_p9 = por %p107_p6, %p49_p1  ;;  %p413_p12 = scmp.ge.s32.totalorder %s689_s14, 2 }
  0x11   : > { %s771_s23 = scalar_select %p40_p7, %s677_s11, %s42_s18  }
  0x12   : > { %p773_p11 = por %p113_p10, %p55_p3  ;;  %129 = sbr.rel (%p413_p12) target bundleno = 95 (0x5f), region = 16 }
  0x17   : > { %132 = sbr.rel (!%p756_p4) target bundleno = 59 (0x3b), region = 20  ;;  %s133_s25 = sand.u32 (%p756_p4), 1, %s677_s11  }
  0x18   : > { %s415_s26 = sshll.u32 (%p756_p4), %s685_s13, 1  ;;  %s414_s27 = sshll.u32 (%p756_p4), %s133_s25, 5 }
  0x19   : > { %s140_s28 = ssub.s32 (%p756_p4), 3, %s415_s26  ;;  %s787_s4 = scalar_lea.sflag (%p756_p4), [#allocation3], %s133_s25 }
  0x1a   : > { %p141_p13 = scmp.lt.s32.totalorder (%p756_p4), %s140_s28, 2  ;;  %s137_s5 = scalar_lea.vmem (%p756_p4), [#allocation2], %s414_s27 }
  0x1c   : > { %s970_s28 = smov (!%p141_p13, %s140_s28), 2 }
  0x1d   : > { %s445_s29 = sshll.u32 %s970_s28, 4 }
  0x1e   : > { %s145_s30 = ssub.s32 32, %s445_s29 }
  0x1f   : > { %s146_s3 = sshll.u32 %s145_s30, 4 }
  0x20   : > { %147 = vsyncadd %s787_s4, %s146_s3  ;;  %p790_p0 = scmp.ne.s32.totalorder %s445_s29, 0  ;;  %s447_s7 = sshll.u32 %s685_s13, 5 }
  0x21   : > { %s152_s16 = scalar_lea.hbm %s952_s0, %s447_s7  ;;  %s798_s18 = sshll.u32 %s137_s5, 4  ;;  %s157_s18 = int_to_ptr.vmem [resolvable:$true] %s798_s18 }
  0x22   : > { %s154_s20 = sshll.u32 %s152_s16, 4  ;;  %s422_s25 = sshll.u32 %s970_s28, 8  ;;  %s801_s20 = int_to_ptr.hbm [resolvable:$true] %s154_s20 }
  0x23   : > { %s514_s26 = sshra.s32 %s801_s20, 4  ;;  %s516_s27 = sshrl.u32 %s422_s25, 4  ;;  %s515_s26 = int_to_ptr.hbm [resolvable:$true] %s514_s26 }
  0x24   : > { %s521_s29 = scalar_lea.hbm %s515_s26, %s516_s27  ;;  %s525_s5 = scalar_lea.hbm %s952_s0, 48 }
  0x25   : > { %p522_p1 = scmp.ne.s32.totalorder %s515_s26, %s521_s29  ;;  %p527_p5 = scmp.lt.s32.totalorder %s525_s5, %s521_s29 }
  0x27   : > { %p523_p2 = pnand %p522_p1, %p790_p0 }
  0x29   : > { %p524_p3 = pneg %p523_p2 }
  0x2b   : > { %p529_p6 = pnand %p527_p5, %p524_p3 }
  0x2d   : > { %532 = shalt.err (!%p529_p6)
}
  0x2e   : > { %s533_s7 = sshra.s32 %s157_s18, 4  ;;  %s691_s15 = smov [#allocation2]   ;;  %s534_s7 = int_to_ptr.vmem [resolvable:$true] %s533_s7 }
  0x2f   : > { %s540_s8 = scalar_lea.vmem %s534_s7, %s516_s27  ;;  %s544_s16 = scalar_lea.vmem %s691_s15, 64 }
  0x30   : > { %p541_p7 = scmp.ne.s32.totalorder %s534_s7, %s540_s8  ;;  %p546_p1 = scmp.lt.s32.totalorder %s544_s16, %s540_s8 }
  0x32   : > { %p542_p10 = pnand %p541_p7, %p790_p0 }
  0x34   : > { %p543_p13 = pneg %p542_p10 }
  0x36   : > { %p548_p2 = pnand %p546_p1, %p543_p13 }
  0x38   : > { %551 = shalt.err (!%p548_p2)
}
  0x39   : > { %s692_s26 = smov 256   ;;  %s693_s29 = smov 16  }
  0x3a   : > { %162 = dma.hbm_to_vmem [thread:$0]  (%p790_p0), %s801_s20, %s422_s25, %s157_s18, %s787_s4, %s692_s26, %s692_s26, %s693_s29  }
  0x3b PF: > { %165 = sbr.rel (!%p756_p4) target bundleno = 95 (0x5f), region = 24  ;;  %s166_s27 = sand.u32 (%p756_p4), 1, %s677_s11  }
  0x3c   : > { %s424_s30 = sshll.u32 (%p756_p4), %s685_s13, 1  ;;  %s423_s3 = sshll.u32 (%p756_p4), %s166_s27, 4 }
  0x3d   : > { %s172_s5 = ssub.s32 (%p756_p4), 3, %s424_s30  ;;  %s831_s15 = scalar_lea.sflag (%p756_p4), [#allocation6], %s166_s27 }
  0x3e   : > { %p173_p3 = scmp.lt.s32.totalorder (%p756_p4), %s172_s5, 2  ;;  %s170_s28 = scalar_lea.vmem (%p756_p4), [#allocation5], %s423_s3 }
  0x40   : > { %s972_s5 = smov (!%p173_p3, %s172_s5), 2 }
  0x41   : > { %s425_s7 = sshll.u32 %s972_s5, 3 }
  0x42   : > { %s176_s8 = ssub.s32 16, %s425_s7 }
  0x43   : > { %s177_s6 = sshll.u32 %s176_s8, 4 }
  0x44   : > { %178 = vsyncadd %s831_s15, %s177_s6  ;;  %p834_p4 = scmp.ne.s32.totalorder %s425_s7, 0  ;;  %s448_s4 = sshll.u32 %s685_s13, 4 }
  0x45   : > { %s181_s25 = scalar_lea.hbm %s953_s1, %s448_s4  ;;  %s842_s16 = sshll.u32 %s170_s28, 4  ;;  %s186_s16 = int_to_ptr.vmem [resolvable:$true] %s842_s16 }
  0x46   : > { %s183_s26 = sshll.u32 %s181_s25, 4  ;;  %s429_s29 = sshll.u32 %s972_s5, 7  ;;  %s845_s26 = int_to_ptr.hbm [resolvable:$true] %s183_s26 }
  0x47   : > { %s553_s27 = sshra.s32 %s845_s26, 4  ;;  %s555_s30 = sshrl.u32 %s429_s29, 4  ;;  %s554_s27 = int_to_ptr.hbm [resolvable:$true] %s553_s27 }
  0x48   : > { %s560_s3 = scalar_lea.hbm %s554_s27, %s555_s30  ;;  %s564_s6 = scalar_lea.hbm %s953_s1, 24 }
  0x49   : > { %p561_p0 = scmp.ne.s32.totalorder %s554_s27, %s560_s3  ;;  %p566_p7 = scmp.lt.s32.totalorder %s564_s6, %s560_s3 }
  0x4b   : > { %p562_p5 = pnand %p561_p0, %p834_p4 }
  0x4d   : > { %p563_p6 = pneg %p562_p5 }
  0x4f   : > { %p568_p10 = pnand %p566_p7, %p563_p6 }
  0x51   : > { %571 = shalt.err (!%p568_p10)
}
  0x52   : > { %s572_s28 = sshra.s32 %s186_s16, 4  ;;  %s694_s18 = smov [#allocation5]   ;;  %s573_s28 = int_to_ptr.vmem [resolvable:$true] %s572_s28 }
  0x53   : > { %s579_s4 = scalar_lea.vmem %s573_s28, %s555_s30  ;;  %s583_s20 = scalar_lea.vmem %s694_s18, 32 }
  0x54   : > { %p580_p13 = scmp.ne.s32.totalorder %s573_s28, %s579_s4  ;;  %p585_p3 = scmp.lt.s32.totalorder %s583_s20, %s579_s4 }
  0x56   : > { %p581_p1 = pnand %p580_p13, %p834_p4 }
  0x58   : > { %p582_p2 = pneg %p581_p1 }
  0x5a   : > { %p587_p0 = pnand %p585_p3, %p582_p2 }
  0x5c   : > { %590 = shalt.err (!%p587_p0)
}
  0x5d   : > { %s695_s25 = smov 128   ;;  %s696_s27 = smov 8  }
  0x5e   : > { %191 = dma.hbm_to_vmem [thread:$0]  (%p834_p4), %s845_s26, %s429_s29, %s186_s16, %s831_s15, %s695_s25, %s695_s25, %s696_s27  }
  0x5f PF: > { %p430_p5 = scmp.ge.s32.totalorder %s689_s14, 1  ;;  %p193_p6 = scmp.lt.s32.totalorder %s689_s14, 3 }
  0x61   : > { %p194_p7 = pnand %p430_p5, %p193_p6 }
  0x62   : > { %s871_s30 = sand.u32 (!%p194_p7), 1, %s673_s10  }
  0x63   : > { %197 = sbr.rel (%p194_p7) target bundleno = 147 (0x93), region = 28  ;;  %s431_s3 = sshll.u32 (!%p194_p7), %s871_s30, 5 }
  0x64   : > { %s200_s7 = scalar_lea.sflag (!%p194_p7), [#allocation3], %s871_s30  ;;  %s203_s19 = scalar_lea.vmem (!%p194_p7), [#allocation2], %s431_s3 }
  0x68   : > { %656 = dma.done.wait (%p762_p8), %s200_s7, 512  }
  0x69   : > { %658 = vsyncadd (%p762_p8), %s200_s7, 4294966784  ;;  %s432_s5 = sshll.u32 %s871_s30, 4  ;;  %s210_s15 = scalar_lea.sflag [#allocation6], %s871_s30 }
  0x6a   : > { %s213_s16 = scalar_lea.vmem [#allocation5], %s432_s5 }
  0x6b   : > { %660 = dma.done.wait (%p762_p8), %s210_s15, 256  }
  0x6c   : > { %662 = vsyncadd (%p762_p8), %s210_s15, 4294967040  ;;  %v259_v0 = vld [vmem:[%s213_s16] sm:$0xff]  ;;  %v260_v2 = vld [vmem:[%s213_s16 + $0x8] sm:$0xff]  ;;  %s239_s26 = scalar_lea.vmem [#allocation7], %s431_s3  ;;  %s274_s29 = scalar_lea.sflag [#allocation4], %s871_s30 }
  0x6d   : > { %v261_v1 = vld [vmem:[%s203_s19] sm:$0xff]  ;;  %v262_v4 = vld [vmem:[%s203_s19 + $0x10] sm:$0xff]  ;;  %v267_v5 = vld [vmem:[%s203_s19 + $0x8] sm:$0xff]  ;;  %s435_s21 = sshll.u32 (%p766_p9), %s681_s12, 1 }
  0x6e   : > { %v263_v3 = vadd.f32 %v261_v1, %v259_v0  ;;  %v268_v6 = vld [vmem:[%s203_s19 + $0x18] sm:$0xff]  ;;  %v264_v7 = vadd.f32 %v262_v4, %v260_v2  ;;  %v269_v8 = vadd.f32 %v267_v5, %v259_v0  ;;  %s283_s8 = ssub.s32 (%p766_p9), 3, %s435_s21 }
  0x6f   : > { %v270_v9 = vadd.f32 %v268_v6, %v260_v2  ;;  %280 = sbr.rel (!%p766_p9) target bundleno = 147 (0x93), region = 40  ;;  %p284_p8 = scmp.lt.s32.totalorder (%p766_p9), %s283_s8, 2 }
  0x70   : > { %265 = vst [vmem:[%s239_s26] sm:$0xff] %v263_v3 }
  0x71   : > { %266 = vst [vmem:[%s239_s26 + $0x10] sm:$0xff] %v264_v7 }
  0x72   : > { %271 = vst [vmem:[%s239_s26 + $0x8] sm:$0xff] %v269_v8 }
  0x73   : > { %272 = vst [vmem:[%s239_s26 + $0x18] sm:$0xff] %v270_v9 }
  0x74   : > { %s974_s8 = smov (!%p284_p8, %s283_s8), 2 }
  0x75   : > { %s449_s6 = sshll.u32 %s974_s8, 4 }
  0x76   : > { %s288_s28 = ssub.s32 32, %s449_s6 }
  0x77   : > { %s289_s4 = sshll.u32 %s288_s28, 4 }
  0x78   : > { %290 = vsyncadd %s274_s29, %s289_s4  ;;  %p894_p4 = scmp.ne.s32.totalorder %s449_s6, 0  ;;  %s451_s22 = sshll.u32 %s681_s12, 5 }
  0x79   : > { %s295_s27 = scalar_lea.hbm %s954_s2, %s451_s22  ;;  %s297_s3 = sshll.u32 %s239_s26, 4  ;;  %s902_s3 = int_to_ptr.vmem [resolvable:$true] %s297_s3 }
  0x7a   : > { %s299_s7 = sshll.u32 %s295_s27, 4  ;;  %s442_s19 = sshll.u32 %s974_s8, 8  ;;  %s904_s7 = int_to_ptr.hbm [resolvable:$true] %s299_s7 }
  0x7b   : > { %s592_s5 = sshra.s32 %s902_s3, 4  ;;  %s594_s15 = sshrl.u32 %s442_s19, 4  ;;  %s593_s5 = int_to_ptr.vmem [resolvable:$true] %s592_s5 }
  0x7c   : > { %s599_s16 = scalar_lea.vmem %s593_s5, %s594_s15  ;;  %s697_s12 = smov [#allocation7]  }
  0x7d   : > { %p600_p9 = scmp.ne.s32.totalorder %s593_s5, %s599_s16  ;;  %s603_s21 = scalar_lea.vmem %s697_s12, 64 }
  0x7e   : > { %p605_p1 = scmp.lt.s32.totalorder %s603_s21, %s599_s16 }
  0x7f   : > { %p601_p10 = pnand %p600_p9, %p894_p4 }
  0x81   : > { %p602_p13 = pneg %p601_p10 }
  0x83   : > { %p607_p2 = pnand %p605_p1, %p602_p13 }
  0x85   : > { %610 = shalt.err (!%p607_p2)
}
  0x86   : > { %s611_s26 = sshra.s32 %s904_s7, 4  ;;  %s622_s22 = scalar_lea.hbm %s954_s2, 48  ;;  %s612_s26 = int_to_ptr.hbm [resolvable:$true] %s611_s26 }
  0x87   : > { %s618_s6 = scalar_lea.hbm %s612_s26, %s594_s15  ;;  %p623_p6 = scmp.lt.s32.totalorder %s612_s26, %s954_s2 }
  0x88   : > { %p619_p3 = scmp.ne.s32.totalorder %s612_s26, %s618_s6  ;;  %p624_p7 = scmp.lt.s32.totalorder %s622_s22, %s618_s6 }
  0x8a   : > { %p620_p0 = pnand %p619_p3, %p894_p4  ;;  %p625_p8 = por %p624_p7, %p623_p6 }
  0x8c   : > { %p621_p5 = pneg %p620_p0 }
  0x8e   : > { %p626_p9 = pnand %p625_p8, %p621_p5 }
  0x90   : > { %629 = shalt.err (!%p626_p9)
}
  0x91   : > { %s698_s27 = smov 256   ;;  %s699_s5 = smov 16  }
  0x92   : > { %305 = dma.vmem_to_hbm [thread:$0]  (%p894_p4), %s902_s3, %s442_s19, %s904_s7, %s274_s29, %s698_s27, %s698_s27, %s699_s5  }
  0x93 PF: > { %s314_s15 = sand.u32 1, %s669_s9   ;;  %p456_p10 = pnand %p413_p12, %p773_p11 }
  0x94   : > { %s315_s16 = scalar_lea.sflag [#allocation4], %s314_s15 }
  0x95   : > { %p457_p13 = pneg %p456_p10 }
  0x97   : > { %664 = dma.done.wait (%p457_p13), %s315_s16, 512  }
  0x98   : > { %666 = vsyncadd (%p457_p13), %s315_s16, 4294966784  ;;  %s21_s14 = sadd.s32 1, %s689_s14   ;;  %s962_s9 = smov %s673_s10 }
  0x99   : > { %p18_p1 = scmp.ge.s32.totalorder %s21_s14, 4   ;;  %s963_s10 = smov %s677_s11 }
  0x9a   : > { %s964_s11 = smov %s771_s23  ;;  %s965_s12 = smov %s685_s13 }
  0x9b   : > { %s966_s13 = smov %s968_s17  ;;  %20 = sbr.rel (!%p18_p1) target bundleno = 8 (0x8), region = 86 }
  0xa0   :  { %321 = vsyncpa [#allocation3], 1 }
  0xa1   :  { %323 = vsyncpa [#allocation3 + $0x1], 1 }
  0xa2   :  { %324 = vsyncpa [#allocation6], 1 }
  0xa3   :  { %326 = vsyncpa [#allocation6 + $0x1], 1 }
  0xa4   :  { %327 = vsyncpa [#allocation4], 1 }
  0xa5   :  { %329 = vsyncpa [#allocation4 + $0x1], 1 }

</bundles_post_ra>
